<compile_context>
chip_gen: v6e
topology: v6e:2x2x1
jax: 0.10.0
libtpu: 0.0.40
codegen_flags: <defaults>
</compile_context>

<pallas_src>
import functools

import jax
import jax.numpy as jnp
from jax import lax
from jax.experimental import pallas as pl
from jax.experimental.pallas import tpu as pltpu


def _round_up(x, m):
    return ((x + m - 1) // m) * m


def lstm_fc_kernel(x_ref, wih_ref, whh_ref, b_ref, fcw_ref, fcb_ref,
                   out_ref, xp_ref, h_ref, c_ref, *,
                   seq_len, chunk_len, unroll):
    """One grid step processes one time chunk of the sequence.

    x_ref:   (TS*Bp, E)  time-major, flattened chunk of embedded inputs
    wih_ref: (E, 4H)     input->gates weights (pre-transposed)
    whh_ref: (H, 4H)     hidden->gates weights (pre-transposed)
    b_ref:   (1, 4H)     combined bias (b_ih + b_hh), f32
    fcw_ref: (H, Op)     final linear weight (pre-transposed, lane-padded)
    fcb_ref: (1, Op)     final linear bias (lane-padded), f32
    out_ref: (Bp, Op)    logits (lane-dense padded output block)
    xp_ref:  (TS*Bp, 4H) VMEM scratch holding the chunk's input projection
    h_ref, c_ref: (Bp, H) LSTM state carried across time-chunk grid steps
    """
    t = pl.program_id(0)
    B, H = h_ref.shape

    @pl.when(t == 0)
    def _init():
        h_ref[...] = jnp.zeros_like(h_ref)
        c_ref[...] = jnp.zeros_like(c_ref)

    # Hoisted input projection: one MXU pass + one bias broadcast per chunk,
    # parked in VMEM scratch (indexed per step; not one giant live value).
    xp_ref[...] = (jnp.dot(x_ref[...], wih_ref[...],
                           preferred_element_type=jnp.float32)
                   + b_ref[...])                                # (TS*B, 4H) f32

    whh = whh_ref[...]                                          # resident
    # Per-gate scale [1,1,2,1] (broadcast over H lanes each) so ONE sigmoid
    # pass over the full 4H vreg gives i,f,o and g = 2*sig-1 (= tanh).
    lane = lax.broadcasted_iota(jnp.int32, (1, 4 * H), 1)
    gate_scale = jnp.where((lane >= 2 * H) & (lane < 3 * H),
                           2.0, 1.0).astype(jnp.float32)

    def step(s, carry):
        h, c = carry
        row = pl.multiple_of(s * B, B)
        gates = (xp_ref[pl.ds(row, B), :]
                 + jnp.dot(h.astype(whh.dtype), whh,
                           preferred_element_type=jnp.float32))  # (B, 4H) f32
        sg = jax.nn.sigmoid(gates * gate_scale)                  # single EUP pass
        i = sg[:, 0 * H:1 * H]
        f = sg[:, 1 * H:2 * H]
        g = 2.0 * sg[:, 2 * H:3 * H] - 1.0                       # tanh(g_gate)
        o = sg[:, 3 * H:4 * H]
        c_new = f * c + i * g
        h_new = o * jnp.tanh(c_new)
        # Mask trailing time-padding (only the last chunk can contain any).
        valid = (t * chunk_len + s) < seq_len
        return jnp.where(valid, h_new, h), jnp.where(valid, c_new, c)

    h, c = lax.fori_loop(0, chunk_len, step, (h_ref[...], c_ref[...]),
                         unroll=unroll)
    h_ref[...] = h
    c_ref[...] = c

    # Final linear layer on the last timestep's hidden state (lane-dense).
    @pl.when(t == pl.num_programs(0) - 1)
    def _final():
        out_ref[...] = (jnp.dot(h.astype(fcw_ref.dtype), fcw_ref[...],
                                preferred_element_type=jnp.float32)
                        + fcb_ref[...])


def init_params(key, vocab_size, embed_dim, hidden_dim, output_dim):
    """Deterministic init mirroring PyTorch defaults (shapes are what matter)."""
    k_emb, k_wih, k_whh, k_bih, k_bhh, k_fw, k_fb = jax.random.split(key, 7)
    bound = 1.0 / jnp.sqrt(hidden_dim)
    return {
        # nn.Embedding: N(0, 1), shape (vocab, E)
        "embedding": jax.random.normal(k_emb, (vocab_size, embed_dim),
                                       jnp.float32),
        # nn.LSTM weight_ih_l0 is (4H, E); stored transposed (E, 4H)
        "w_ih": jax.random.uniform(k_wih, (embed_dim, 4 * hidden_dim),
                                   jnp.float32, -bound, bound),
        # nn.LSTM weight_hh_l0 is (4H, H); stored transposed (H, 4H)
        "w_hh": jax.random.uniform(k_whh, (hidden_dim, 4 * hidden_dim),
                                   jnp.float32, -bound, bound),
        # combined bias b_ih + b_hh, shape (4H,)
        "b": (jax.random.uniform(k_bih, (4 * hidden_dim,), jnp.float32,
                                 -bound, bound)
              + jax.random.uniform(k_bhh, (4 * hidden_dim,), jnp.float32,
                                   -bound, bound)),
        # nn.Linear(H, O): weight (O, H) -> stored transposed (H, O)
        "fc_w": jax.random.uniform(k_fw, (hidden_dim, output_dim),
                                   jnp.float32, -bound, bound),
        "fc_b": jax.random.uniform(k_fb, (output_dim,), jnp.float32,
                                   -bound, bound),
    }


def sentiment_forward(params, input_ids, attention_mask=None, *,
                      time_chunk=None, mxu_dtype=jnp.bfloat16):
    """Matches SentimentModel.forward (attention_mask accepted but unused)."""
    del attention_mask  # unused in the reference forward as well
    B, S = input_ids.shape
    E = params["w_ih"].shape[0]
    H = params["w_hh"].shape[0]
    O = params["fc_w"].shape[1]

    # Hardware-aligned padding: batch -> sublane multiple (8 for f32),
    # FC output -> 128 lanes (lane-dense store). Sliced back at the end.
    Bp = _round_up(B, 8)
    Op = _round_up(O, 128)
    xb = jnp.dtype(mxu_dtype).itemsize

    # Time-chunk sizing: amortize the ~0.35 us / grid-step overhead with big
    # chunks (target ~2 MiB x block) while keeping the per-chunk footprint
    # (double-buffered x stream + f32 xproj scratch) well under scoped VMEM,
    # including v7x's 64 MiB physical / 32 MiB scoped budget.
    if time_chunk is None:
        per_step = 2 * Bp * E * xb + Bp * 4 * H * 4
        ts_vmem = max(1, (20 << 20) // per_step)
        ts_block = max(1, (2 << 20) // max(1, Bp * E * xb))
        TS = max(1, min(S, ts_vmem, ts_block))
    else:
        TS = max(1, min(int(time_chunk), S))
    Sp = _round_up(S, TS)          # pad time; padded steps masked in-kernel
    n_chunks = Sp // TS

    # Embedding lookup directly into flattened time-major (Sp*Bp, E): pad the
    # tiny int id matrix (batch -> sublanes, time -> chunk multiple) and
    # transpose the ids, never the embedded (S,B,E) activations.
    ids = jnp.pad(input_ids, ((0, Bp - B), (0, Sp - S)))            # (Bp, Sp)
    x = jnp.take(params["embedding"], ids.T.reshape(-1), axis=0)    # (Sp*Bp, E)
    x = x.astype(mxu_dtype)
    # TODO(synk): fuse this gather into the kernel (scalar-prefetch ids to
    # SMEM, embedding table with memory_space=pl.ANY, manual DMA-gather per
    # chunk) to avoid one full HBM write+re-read of the embedded activations.

    w_ih = params["w_ih"].astype(mxu_dtype)
    w_hh = params["w_hh"].astype(mxu_dtype)
    b = params["b"].reshape(1, 4 * H).astype(jnp.float32)
    fc_w = jnp.pad(params["fc_w"], ((0, 0), (0, Op - O))).astype(mxu_dtype)
    fc_b = jnp.pad(params["fc_b"], (0, Op - O)).reshape(1, Op).astype(jnp.float32)

    # Explicit scoped-VMEM limit sized to the actual footprint (defaults are
    # 16 MiB v5e / 32 MiB v6e+v7x), capped below v7x's 64 MiB physical VMEM.
    stream = 2 * TS * Bp * E * xb                                   # x double buffer
    resident = 2 * ((E * 4 * H + H * 4 * H + H * Op) * xb
                    + (4 * H + Op) * 4)                             # weights + biases
    scratch = TS * Bp * 4 * H * 4 + 2 * Bp * H * 4 + 2 * Bp * Op * 4
    vmem_limit = int(min(max(stream + resident + scratch + (4 << 20), 16 << 20),
                         56 << 20))

    kernel = functools.partial(lstm_fc_kernel, seq_len=S, chunk_len=TS,
                               unroll=min(TS, 8))

    grid_spec = pltpu.PrefetchScalarGridSpec(
        num_scalar_prefetch=0,
        grid=(n_chunks,),
        in_specs=[
            # stream time chunks of the embedded sequence
            pl.BlockSpec((TS * Bp, E), lambda t: (t, 0)),
            # weights / biases stay resident (constant block index)
            # TODO(synk): mark these with pipeline_mode=pl.Buffered(1) to halve
            # their VMEM residency at realistic H (matters on v7x's 64 MiB).
            pl.BlockSpec((E, 4 * H), lambda t: (0, 0)),
            pl.BlockSpec((H, 4 * H), lambda t: (0, 0)),
            pl.BlockSpec((1, 4 * H), lambda t: (0, 0)),
            pl.BlockSpec((H, Op), lambda t: (0, 0)),
            pl.BlockSpec((1, Op), lambda t: (0, 0)),
        ],
        out_specs=pl.BlockSpec((Bp, Op), lambda t: (0, 0)),
        scratch_shapes=[
            pltpu.VMEM((TS * Bp, 4 * H), jnp.float32),  # xproj for one chunk
            pltpu.VMEM((Bp, H), jnp.float32),           # h carried across chunks
            pltpu.VMEM((Bp, H), jnp.float32),           # c carried across chunks
        ],
    )
    # TODO(synk): for Bp > 8 add a leading "parallel" batch-tile grid axis
    # (per-tile h/c scratch) so v7x's two TensorCores run independent rows.

    out = pl.pallas_call(
        kernel,
        out_shape=jax.ShapeDtypeStruct((Bp, Op), jnp.float32),
        grid_spec=grid_spec,
        compiler_params=pltpu.CompilerParams(
            dimension_semantics=("arbitrary",),
            vmem_limit_bytes=vmem_limit),
    )(x, w_ih, w_hh, b, fc_w, fc_b)

    return out[:B, :O]


def sentiment_forward_ref(params, input_ids, attention_mask=None):
    """Pure-JAX reference matching PyTorch LSTM semantics (for verification)."""
    del attention_mask
    emb = jnp.take(params["embedding"], input_ids, axis=0)     # (B, S, E)
    B, S, E = emb.shape
    H = params["w_hh"].shape[0]
    h = jnp.zeros((B, H), jnp.float32)
    c = jnp.zeros((B, H), jnp.float32)
    for t in range(S):
        gates = emb[:, t, :] @ params["w_ih"] + h @ params["w_hh"] + params["b"]
        i = jax.nn.sigmoid(gates[:, 0:H])
        f = jax.nn.sigmoid(gates[:, H:2 * H])
        g = jnp.tanh(gates[:, 2 * H:3 * H])
        o = jax.nn.sigmoid(gates[:, 3 * H:4 * H])
        c = f * c + i * g
        h = o * jnp.tanh(c)
    return h @ params["fc_w"] + params["fc_b"]


if __name__ == "__main__":
    # Small shapes consistent with the module's forward.
    VOCAB = 100
    EMBED_DIM = 32
    HIDDEN_DIM = 32
    NUM_CLASSES = 6   # len(label_encoder_classes)
    BATCH = 2
    SEQ = 8

    key = jax.random.PRNGKey(0)
    k_params, k_ids = jax.random.split(key)
    params = init_params(k_params, VOCAB, EMBED_DIM, HIDDEN_DIM, NUM_CLASSES)

    input_ids = jax.random.randint(k_ids, (BATCH, SEQ), 0, VOCAB, jnp.int32)
    attention_mask = jnp.ones((BATCH, SEQ), jnp.int32)  # unused, as in PyTorch

    ref = sentiment_forward_ref(params, input_ids, attention_mask)

    # f32 MXU operands, auto chunk (single grid step at S=8): strict check.
    out_f32 = jax.block_until_ready(
        sentiment_forward(params, input_ids, attention_mask,
                          mxu_dtype=jnp.float32))
    assert out_f32.shape == (BATCH, NUM_CLASSES)
    assert jnp.allclose(out_f32, ref, atol=2e-3, rtol=2e-3), \
        "f32 kernel/ref mismatch"

    # f32, non-divisible time chunk (exercises time padding + in-kernel mask).
    out_chunked = jax.block_until_ready(
        sentiment_forward(params, input_ids, attention_mask,
                          time_chunk=3, mxu_dtype=jnp.float32))
    assert jnp.allclose(out_chunked, ref, atol=2e-3, rtol=2e-3), \
        "chunked kernel/ref mismatch"

    # Production path: bf16 MXU operands (halves x/weight DMA + VMEM); f32
    # accumulation and f32 gate/cell elementwise math stay inside the kernel.
    out_bf16 = jax.block_until_ready(
        sentiment_forward(params, input_ids, attention_mask,
                          mxu_dtype=jnp.bfloat16))
    assert out_bf16.shape == (BATCH, NUM_CLASSES)
    assert jnp.allclose(out_bf16, ref, atol=5e-2, rtol=5e-2), \
        "bf16 kernel/ref mismatch"

    print("KERNEL_OK")
</pallas_src>

<mosaic_0001>
module attributes {stable_mosaic.version = 11 : i64} {
  func.func @lstm_fc_kernel(%arg0: i32, %arg1: memref<64x32xf32, #tpu.memory_space<vmem>>, %arg2: memref<32x128xf32, #tpu.memory_space<vmem>>, %arg3: memref<32x128xf32, #tpu.memory_space<vmem>>, %arg4: memref<1x128xf32, #tpu.memory_space<vmem>>, %arg5: memref<32x128xf32, #tpu.memory_space<vmem>>, %arg6: memref<1x128xf32, #tpu.memory_space<vmem>>, %arg7: memref<8x128xf32, #tpu.memory_space<vmem>>, %arg8: memref<64x128xf32, #tpu.memory_space<vmem>>, %arg9: memref<8x32xf32, #tpu.memory_space<vmem>>, %arg10: memref<8x32xf32, #tpu.memory_space<vmem>>) attributes {dimension_semantics = [#tpu.dimension_semantics<arbitrary>], iteration_bounds = array<i64: 1>, scalar_prefetch = 0 : i64, scratch_operands = 3 : i64, tpu.core_type = #tpu.core_type<tc>, window_params = [{transform_indices = @transform_0, window_bounds = array<i64: 64, 32>}, {pipeline_mode = #tpu.pipeline_mode<synchronous>, transform_indices = @transform_1, window_bounds = array<i64: 32, 128>}, {pipeline_mode = #tpu.pipeline_mode<synchronous>, transform_indices = @transform_2, window_bounds = array<i64: 32, 128>}, {pipeline_mode = #tpu.pipeline_mode<synchronous>, transform_indices = @transform_3, window_bounds = array<i64: 1, 128>}, {pipeline_mode = #tpu.pipeline_mode<synchronous>, transform_indices = @transform_4, window_bounds = array<i64: 32, 128>}, {pipeline_mode = #tpu.pipeline_mode<synchronous>, transform_indices = @transform_5, window_bounds = array<i64: 1, 128>}, {pipeline_mode = #tpu.pipeline_mode<synchronous>, transform_indices = @transform_6, window_bounds = array<i64: 8, 128>}]} {
    %c0_i32 = arith.constant 0 : i32
    %0 = arith.cmpi eq, %arg0, %c0_i32 : i32
    %1 = arith.extui %0 : i1 to i32
    %c0_i32_0 = arith.constant 0 : i32
    %2 = arith.cmpi ne, %1, %c0_i32_0 : i32
    scf.if %2 {
      %cst_87 = arith.constant 0.000000e+00 : f32
      %275 = vector.broadcast %cst_87 : f32 to vector<8x32xf32>
      %c0_88 = arith.constant 0 : index
      %c0_89 = arith.constant 0 : index
      %276 = vector.load %arg9[%c0_88, %c0_89] : memref<8x32xf32, #tpu.memory_space<vmem>>, vector<8x32xf32>
      tpu.vector_store %arg9[%c0_88, %c0_89], %275 {strides = array<i32>} : memref<8x32xf32, #tpu.memory_space<vmem>>, vector<8x32xf32>,
      %cst_90 = arith.constant 0.000000e+00 : f32
      %277 = vector.broadcast %cst_90 : f32 to vector<8x32xf32>
      %c0_91 = arith.constant 0 : index
      %c0_92 = arith.constant 0 : index
      %278 = vector.load %arg10[%c0_91, %c0_92] : memref<8x32xf32, #tpu.memory_space<vmem>>, vector<8x32xf32>
      tpu.vector_store %arg10[%c0_91, %c0_92], %277 {strides = array<i32>} : memref<8x32xf32, #tpu.memory_space<vmem>>, vector<8x32xf32>,
    } else {
    }
    %c0 = arith.constant 0 : index
    %c0_1 = arith.constant 0 : index
    %3 = vector.load %arg1[%c0, %c0_1] : memref<64x32xf32, #tpu.memory_space<vmem>>, vector<64x32xf32>
    %c0_2 = arith.constant 0 : index
    %c0_3 = arith.constant 0 : index
    %4 = vector.load %arg2[%c0_2, %c0_3] : memref<32x128xf32, #tpu.memory_space<vmem>>, vector<32x128xf32>
    %cst = arith.constant dense<0.000000e+00> : vector<64x128xf32>
    %5 = tpu.matmul %3, %4, %cst {dimension_numbers = #tpu.dot_dimension_numbers<[1], [0], [0], [1], [0, 0, 1, 1], [], []>} : vector<64x32xf32>, vector<32x128xf32>, vector<64x128xf32> -> vector<64x128xf32>
    %c0_4 = arith.constant 0 : index
    %c0_5 = arith.constant 0 : index
    %6 = vector.load %arg4[%c0_4, %c0_5] : memref<1x128xf32, #tpu.memory_space<vmem>>, vector<1x128xf32>
    %7 = vector.broadcast %6 : vector<1x128xf32> to vector<64x128xf32>
    %8 = arith.addf %5, %7 : vector<64x128xf32>
    %c0_6 = arith.constant 0 : index
    %c0_7 = arith.constant 0 : index
    %9 = vector.load %arg8[%c0_6, %c0_7] : memref<64x128xf32, #tpu.memory_space<vmem>>, vector<64x128xf32>
    tpu.vector_store %arg8[%c0_6, %c0_7], %8 {strides = array<i32>} : memref<64x128xf32, #tpu.memory_space<vmem>>, vector<64x128xf32>,
    %c0_8 = arith.constant 0 : index
    %c0_9 = arith.constant 0 : index
    %10 = vector.load %arg3[%c0_8, %c0_9] : memref<32x128xf32, #tpu.memory_space<vmem>>, vector<32x128xf32>
    %11 = tpu.iota {dimensions = array<i32: 1>} : vector<1x128xi32>
    %c64_i32 = arith.constant 64 : i32
    %12 = vector.broadcast %c64_i32 : i32 to vector<1x128xi32>
    %13 = arith.cmpi sge, %11, %12 : vector<1x128xi32>
    %c96_i32 = arith.constant 96 : i32
    %14 = vector.broadcast %c96_i32 : i32 to vector<1x128xi32>
    %15 = arith.cmpi slt, %11, %14 : vector<1x128xi32>
    %16 = arith.andi %13, %15 : vector<1x128xi1>
    %cst_10 = arith.constant 2.000000e+00 : f32
    %cst_11 = arith.constant 1.000000e+00 : f32
    %17 = vector.broadcast %cst_10 : f32 to vector<1x128xf32>
    %18 = vector.broadcast %cst_11 : f32 to vector<1x128xf32>
    %19 = arith.select %16, %17, %18 : vector<1x128xi1>, vector<1x128xf32>
    %c0_12 = arith.constant 0 : index
    %c0_13 = arith.constant 0 : index
    %20 = vector.load %arg9[%c0_12, %c0_13] : memref<8x32xf32, #tpu.memory_space<vmem>>, vector<8x32xf32>
    %c0_14 = arith.constant 0 : index
    %c0_15 = arith.constant 0 : index
    %21 = vector.load %arg10[%c0_14, %c0_15] : memref<8x32xf32, #tpu.memory_space<vmem>>, vector<8x32xf32>
    %c0_i32_16 = arith.constant 0 : i32
    %c8_i32 = arith.constant 8 : i32
    %22 = arith.muli %c0_i32_16, %c8_i32 : i32
    %23 = tpu.assume_multiple %22, 8 : i32
    %24 = arith.index_cast %23 : i32 to index
    %c0_17 = arith.constant 0 : index
    %25 = vector.load %arg8[%24, %c0_17] : memref<64x128xf32, #tpu.memory_space<vmem>>, vector<8x128xf32>
    %cst_18 = arith.constant dense<0.000000e+00> : vector<8x128xf32>
    %26 = tpu.matmul %20, %10, %cst_18 {dimension_numbers = #tpu.dot_dimension_numbers<[1], [0], [0], [1], [0, 0, 1, 1], [], []>} : vector<8x32xf32>, vector<32x128xf32>, vector<8x128xf32> -> vector<8x128xf32>
    %27 = arith.addf %25, %26 : vector<8x128xf32>
    %28 = vector.broadcast %19 : vector<1x128xf32> to vector<8x128xf32>
    %29 = arith.mulf %27, %28 : vector<8x128xf32>
    %30 = arith.negf %29 : vector<8x128xf32>
    %31 = math.exp %30 : vector<8x128xf32>
    %cst_19 = arith.constant 1.000000e+00 : f32
    %32 = vector.broadcast %cst_19 : f32 to vector<8x128xf32>
    %33 = arith.addf %32, %31 : vector<8x128xf32>
    %34 = arith.divf %32, %33 : vector<8x128xf32>
    %35 = vector.extract_strided_slice %34 {offsets = [0, 0], sizes = [8, 32], strides = [1, 1]} : vector<8x128xf32> to vector<8x32xf32>
    %36 = vector.extract_strided_slice %34 {offsets = [0, 32], sizes = [8, 32], strides = [1, 1]} : vector<8x128xf32> to vector<8x32xf32>
    %37 = vector.extract_strided_slice %34 {offsets = [0, 64], sizes = [8, 32], strides = [1, 1]} : vector<8x128xf32> to vector<8x32xf32>
    %cst_20 = arith.constant 2.000000e+00 : f32
    %38 = vector.broadcast %cst_20 : f32 to vector<8x32xf32>
    %39 = arith.mulf %38, %37 : vector<8x32xf32>
    %cst_21 = arith.constant 1.000000e+00 : f32
    %40 = vector.broadcast %cst_21 : f32 to vector<8x32xf32>
    %41 = arith.subf %39, %40 : vector<8x32xf32>
    %42 = vector.extract_strided_slice %34 {offsets = [0, 96], sizes = [8, 32], strides = [1, 1]} : vector<8x128xf32> to vector<8x32xf32>
    %43 = arith.mulf %36, %21 : vector<8x32xf32>
    %44 = arith.mulf %35, %41 : vector<8x32xf32>
    %45 = arith.addf %43, %44 : vector<8x32xf32>
    %46 = math.tanh %45 : vector<8x32xf32>
    %47 = arith.mulf %42, %46 : vector<8x32xf32>
    %c8_i32_22 = arith.constant 8 : i32
    %48 = arith.muli %arg0, %c8_i32_22 : i32
    %49 = arith.addi %48, %c0_i32_16 : i32
    %c8_i32_23 = arith.constant 8 : i32
    %50 = arith.cmpi slt, %49, %c8_i32_23 : i32
    %51 = arith.select %50, %47, %20 : vector<8x32xf32>
    %52 = arith.select %50, %45, %21 : vector<8x32xf32>
    %c1_i32 = arith.constant 1 : i32
    %c8_i32_24 = arith.constant 8 : i32
    %53 = arith.muli %c1_i32, %c8_i32_24 : i32
    %54 = tpu.assume_multiple %53, 8 : i32
    %55 = arith.index_cast %54 : i32 to index
    %c0_25 = arith.constant 0 : index
    %56 = vector.load %arg8[%55, %c0_25] : memref<64x128xf32, #tpu.memory_space<vmem>>, vector<8x128xf32>
    %cst_26 = arith.constant dense<0.000000e+00> : vector<8x128xf32>
    %57 = tpu.matmul %51, %10, %cst_26 {dimension_numbers = #tpu.dot_dimension_numbers<[1], [0], [0], [1], [0, 0, 1, 1], [], []>} : vector<8x32xf32>, vector<32x128xf32>, vector<8x128xf32> -> vector<8x128xf32>
    %58 = arith.addf %56, %57 : vector<8x128xf32>
    %59 = vector.broadcast %19 : vector<1x128xf32> to vector<8x128xf32>
    %60 = arith.mulf %58, %59 : vector<8x128xf32>
    %61 = arith.negf %60 : vector<8x128xf32>
    %62 = math.exp %61 : vector<8x128xf32>
    %cst_27 = arith.constant 1.000000e+00 : f32
    %63 = vector.broadcast %cst_27 : f32 to vector<8x128xf32>
    %64 = arith.addf %63, %62 : vector<8x128xf32>
    %65 = arith.divf %63, %64 : vector<8x128xf32>
    %66 = vector.extract_strided_slice %65 {offsets = [0, 0], sizes = [8, 32], strides = [1, 1]} : vector<8x128xf32> to vector<8x32xf32>
    %67 = vector.extract_strided_slice %65 {offsets = [0, 32], sizes = [8, 32], strides = [1, 1]} : vector<8x128xf32> to vector<8x32xf32>
    %68 = vector.extract_strided_slice %65 {offsets = [0, 64], sizes = [8, 32], strides = [1, 1]} : vector<8x128xf32> to vector<8x32xf32>
    %cst_28 = arith.constant 2.000000e+00 : f32
    %69 = vector.broadcast %cst_28 : f32 to vector<8x32xf32>
    %70 = arith.mulf %69, %68 : vector<8x32xf32>
    %cst_29 = arith.constant 1.000000e+00 : f32
    %71 = vector.broadcast %cst_29 : f32 to vector<8x32xf32>
    %72 = arith.subf %70, %71 : vector<8x32xf32>
    %73 = vector.extract_strided_slice %65 {offsets = [0, 96], sizes = [8, 32], strides = [1, 1]} : vector<8x128xf32> to vector<8x32xf32>
    %74 = arith.mulf %67, %52 : vector<8x32xf32>
    %75 = arith.mulf %66, %72 : vector<8x32xf32>
    %76 = arith.addf %74, %75 : vector<8x32xf32>
    %77 = math.tanh %76 : vector<8x32xf32>
    %78 = arith.mulf %73, %77 : vector<8x32xf32>
    %c8_i32_30 = arith.constant 8 : i32
    %79 = arith.muli %arg0, %c8_i32_30 : i32
    %80 = arith.addi %79, %c1_i32 : i32
    %c8_i32_31 = arith.constant 8 : i32
    %81 = arith.cmpi slt, %80, %c8_i32_31 : i32
    %82 = arith.select %81, %78, %51 : vector<8x32xf32>
    %83 = arith.select %81, %76, %52 : vector<8x32xf32>
    %c2_i32 = arith.constant 2 : i32
    %c8_i32_32 = arith.constant 8 : i32
    %84 = arith.muli %c2_i32, %c8_i32_32 : i32
    %85 = tpu.assume_multiple %84, 8 : i32
    %86 = arith.index_cast %85 : i32 to index
    %c0_33 = arith.constant 0 : index
    %87 = vector.load %arg8[%86, %c0_33] : memref<64x128xf32, #tpu.memory_space<vmem>>, vector<8x128xf32>
    %cst_34 = arith.constant dense<0.000000e+00> : vector<8x128xf32>
    %88 = tpu.matmul %82, %10, %cst_34 {dimension_numbers = #tpu.dot_dimension_numbers<[1], [0], [0], [1], [0, 0, 1, 1], [], []>} : vector<8x32xf32>, vector<32x128xf32>, vector<8x128xf32> -> vector<8x128xf32>
    %89 = arith.addf %87, %88 : vector<8x128xf32>
    %90 = vector.broadcast %19 : vector<1x128xf32> to vector<8x128xf32>
    %91 = arith.mulf %89, %90 : vector<8x128xf32>
    %92 = arith.negf %91 : vector<8x128xf32>
    %93 = math.exp %92 : vector<8x128xf32>
    %cst_35 = arith.constant 1.000000e+00 : f32
    %94 = vector.broadcast %cst_35 : f32 to vector<8x128xf32>
    %95 = arith.addf %94, %93 : vector<8x128xf32>
    %96 = arith.divf %94, %95 : vector<8x128xf32>
    %97 = vector.extract_strided_slice %96 {offsets = [0, 0], sizes = [8, 32], strides = [1, 1]} : vector<8x128xf32> to vector<8x32xf32>
    %98 = vector.extract_strided_slice %96 {offsets = [0, 32], sizes = [8, 32], strides = [1, 1]} : vector<8x128xf32> to vector<8x32xf32>
    %99 = vector.extract_strided_slice %96 {offsets = [0, 64], sizes = [8, 32], strides = [1, 1]} : vector<8x128xf32> to vector<8x32xf32>
    %cst_36 = arith.constant 2.000000e+00 : f32
    %100 = vector.broadcast %cst_36 : f32 to vector<8x32xf32>
    %101 = arith.mulf %100, %99 : vector<8x32xf32>
    %cst_37 = arith.constant 1.000000e+00 : f32
    %102 = vector.broadcast %cst_37 : f32 to vector<8x32xf32>
    %103 = arith.subf %101, %102 : vector<8x32xf32>
    %104 = vector.extract_strided_slice %96 {offsets = [0, 96], sizes = [8, 32], strides = [1, 1]} : vector<8x128xf32> to vector<8x32xf32>
    %105 = arith.mulf %98, %83 : vector<8x32xf32>
    %106 = arith.mulf %97, %103 : vector<8x32xf32>
    %107 = arith.addf %105, %106 : vector<8x32xf32>
    %108 = math.tanh %107 : vector<8x32xf32>
    %109 = arith.mulf %104, %108 : vector<8x32xf32>
    %c8_i32_38 = arith.constant 8 : i32
    %110 = arith.muli %arg0, %c8_i32_38 : i32
    %111 = arith.addi %110, %c2_i32 : i32
    %c8_i32_39 = arith.constant 8 : i32
    %112 = arith.cmpi slt, %111, %c8_i32_39 : i32
    %113 = arith.select %112, %109, %82 : vector<8x32xf32>
    %114 = arith.select %112, %107, %83 : vector<8x32xf32>
    %c3_i32 = arith.constant 3 : i32
    %c8_i32_40 = arith.constant 8 : i32
    %115 = arith.muli %c3_i32, %c8_i32_40 : i32
    %116 = tpu.assume_multiple %115, 8 : i32
    %117 = arith.index_cast %116 : i32 to index
    %c0_41 = arith.constant 0 : index
    %118 = vector.load %arg8[%117, %c0_41] : memref<64x128xf32, #tpu.memory_space<vmem>>, vector<8x128xf32>
    %cst_42 = arith.constant dense<0.000000e+00> : vector<8x128xf32>
    %119 = tpu.matmul %113, %10, %cst_42 {dimension_numbers = #tpu.dot_dimension_numbers<[1], [0], [0], [1], [0, 0, 1, 1], [], []>} : vector<8x32xf32>, vector<32x128xf32>, vector<8x128xf32> -> vector<8x128xf32>
    %120 = arith.addf %118, %119 : vector<8x128xf32>
    %121 = vector.broadcast %19 : vector<1x128xf32> to vector<8x128xf32>
    %122 = arith.mulf %120, %121 : vector<8x128xf32>
    %123 = arith.negf %122 : vector<8x128xf32>
    %124 = math.exp %123 : vector<8x128xf32>
    %cst_43 = arith.constant 1.000000e+00 : f32
    %125 = vector.broadcast %cst_43 : f32 to vector<8x128xf32>
    %126 = arith.addf %125, %124 : vector<8x128xf32>
    %127 = arith.divf %125, %126 : vector<8x128xf32>
    %128 = vector.extract_strided_slice %127 {offsets = [0, 0], sizes = [8, 32], strides = [1, 1]} : vector<8x128xf32> to vector<8x32xf32>
    %129 = vector.extract_strided_slice %127 {offsets = [0, 32], sizes = [8, 32], strides = [1, 1]} : vector<8x128xf32> to vector<8x32xf32>
    %130 = vector.extract_strided_slice %127 {offsets = [0, 64], sizes = [8, 32], strides = [1, 1]} : vector<8x128xf32> to vector<8x32xf32>
    %cst_44 = arith.constant 2.000000e+00 : f32
    %131 = vector.broadcast %cst_44 : f32 to vector<8x32xf32>
    %132 = arith.mulf %131, %130 : vector<8x32xf32>
    %cst_45 = arith.constant 1.000000e+00 : f32
    %133 = vector.broadcast %cst_45 : f32 to vector<8x32xf32>
    %134 = arith.subf %132, %133 : vector<8x32xf32>
    %135 = vector.extract_strided_slice %127 {offsets = [0, 96], sizes = [8, 32], strides = [1, 1]} : vector<8x128xf32> to vector<8x32xf32>
    %136 = arith.mulf %129, %114 : vector<8x32xf32>
    %137 = arith.mulf %128, %134 : vector<8x32xf32>
    %138 = arith.addf %136, %137 : vector<8x32xf32>
    %139 = math.tanh %138 : vector<8x32xf32>
    %140 = arith.mulf %135, %139 : vector<8x32xf32>
    %c8_i32_46 = arith.constant 8 : i32
    %141 = arith.muli %arg0, %c8_i32_46 : i32
    %142 = arith.addi %141, %c3_i32 : i32
    %c8_i32_47 = arith.constant 8 : i32
    %143 = arith.cmpi slt, %142, %c8_i32_47 : i32
    %144 = arith.select %143, %140, %113 : vector<8x32xf32>
    %145 = arith.select %143, %138, %114 : vector<8x32xf32>
    %c4_i32 = arith.constant 4 : i32
    %c8_i32_48 = arith.constant 8 : i32
    %146 = arith.muli %c4_i32, %c8_i32_48 : i32
    %147 = tpu.assume_multiple %146, 8 : i32
    %148 = arith.index_cast %147 : i32 to index
    %c0_49 = arith.constant 0 : index
    %149 = vector.load %arg8[%148, %c0_49] : memref<64x128xf32, #tpu.memory_space<vmem>>, vector<8x128xf32>
    %cst_50 = arith.constant dense<0.000000e+00> : vector<8x128xf32>
    %150 = tpu.matmul %144, %10, %cst_50 {dimension_numbers = #tpu.dot_dimension_numbers<[1], [0], [0], [1], [0, 0, 1, 1], [], []>} : vector<8x32xf32>, vector<32x128xf32>, vector<8x128xf32> -> vector<8x128xf32>
    %151 = arith.addf %149, %150 : vector<8x128xf32>
    %152 = vector.broadcast %19 : vector<1x128xf32> to vector<8x128xf32>
    %153 = arith.mulf %151, %152 : vector<8x128xf32>
    %154 = arith.negf %153 : vector<8x128xf32>
    %155 = math.exp %154 : vector<8x128xf32>
    %cst_51 = arith.constant 1.000000e+00 : f32
    %156 = vector.broadcast %cst_51 : f32 to vector<8x128xf32>
    %157 = arith.addf %156, %155 : vector<8x128xf32>
    %158 = arith.divf %156, %157 : vector<8x128xf32>
    %159 = vector.extract_strided_slice %158 {offsets = [0, 0], sizes = [8, 32], strides = [1, 1]} : vector<8x128xf32> to vector<8x32xf32>
    %160 = vector.extract_strided_slice %158 {offsets = [0, 32], sizes = [8, 32], strides = [1, 1]} : vector<8x128xf32> to vector<8x32xf32>
    %161 = vector.extract_strided_slice %158 {offsets = [0, 64], sizes = [8, 32], strides = [1, 1]} : vector<8x128xf32> to vector<8x32xf32>
    %cst_52 = arith.constant 2.000000e+00 : f32
    %162 = vector.broadcast %cst_52 : f32 to vector<8x32xf32>
    %163 = arith.mulf %162, %161 : vector<8x32xf32>
    %cst_53 = arith.constant 1.000000e+00 : f32
    %164 = vector.broadcast %cst_53 : f32 to vector<8x32xf32>
    %165 = arith.subf %163, %164 : vector<8x32xf32>
    %166 = vector.extract_strided_slice %158 {offsets = [0, 96], sizes = [8, 32], strides = [1, 1]} : vector<8x128xf32> to vector<8x32xf32>
    %167 = arith.mulf %160, %145 : vector<8x32xf32>
    %168 = arith.mulf %159, %165 : vector<8x32xf32>
    %169 = arith.addf %167, %168 : vector<8x32xf32>
    %170 = math.tanh %169 : vector<8x32xf32>
    %171 = arith.mulf %166, %170 : vector<8x32xf32>
    %c8_i32_54 = arith.constant 8 : i32
    %172 = arith.muli %arg0, %c8_i32_54 : i32
    %173 = arith.addi %172, %c4_i32 : i32
    %c8_i32_55 = arith.constant 8 : i32
    %174 = arith.cmpi slt, %173, %c8_i32_55 : i32
    %175 = arith.select %174, %171, %144 : vector<8x32xf32>
    %176 = arith.select %174, %169, %145 : vector<8x32xf32>
    %c5_i32 = arith.constant 5 : i32
    %c8_i32_56 = arith.constant 8 : i32
    %177 = arith.muli %c5_i32, %c8_i32_56 : i32
    %178 = tpu.assume_multiple %177, 8 : i32
    %179 = arith.index_cast %178 : i32 to index
    %c0_57 = arith.constant 0 : index
    %180 = vector.load %arg8[%179, %c0_57] : memref<64x128xf32, #tpu.memory_space<vmem>>, vector<8x128xf32>
    %cst_58 = arith.constant dense<0.000000e+00> : vector<8x128xf32>
    %181 = tpu.matmul %175, %10, %cst_58 {dimension_numbers = #tpu.dot_dimension_numbers<[1], [0], [0], [1], [0, 0, 1, 1], [], []>} : vector<8x32xf32>, vector<32x128xf32>, vector<8x128xf32> -> vector<8x128xf32>
    %182 = arith.addf %180, %181 : vector<8x128xf32>
    %183 = vector.broadcast %19 : vector<1x128xf32> to vector<8x128xf32>
    %184 = arith.mulf %182, %183 : vector<8x128xf32>
    %185 = arith.negf %184 : vector<8x128xf32>
    %186 = math.exp %185 : vector<8x128xf32>
    %cst_59 = arith.constant 1.000000e+00 : f32
    %187 = vector.broadcast %cst_59 : f32 to vector<8x128xf32>
    %188 = arith.addf %187, %186 : vector<8x128xf32>
    %189 = arith.divf %187, %188 : vector<8x128xf32>
    %190 = vector.extract_strided_slice %189 {offsets = [0, 0], sizes = [8, 32], strides = [1, 1]} : vector<8x128xf32> to vector<8x32xf32>
    %191 = vector.extract_strided_slice %189 {offsets = [0, 32], sizes = [8, 32], strides = [1, 1]} : vector<8x128xf32> to vector<8x32xf32>
    %192 = vector.extract_strided_slice %189 {offsets = [0, 64], sizes = [8, 32], strides = [1, 1]} : vector<8x128xf32> to vector<8x32xf32>
    %cst_60 = arith.constant 2.000000e+00 : f32
    %193 = vector.broadcast %cst_60 : f32 to vector<8x32xf32>
    %194 = arith.mulf %193, %192 : vector<8x32xf32>
    %cst_61 = arith.constant 1.000000e+00 : f32
    %195 = vector.broadcast %cst_61 : f32 to vector<8x32xf32>
    %196 = arith.subf %194, %195 : vector<8x32xf32>
    %197 = vector.extract_strided_slice %189 {offsets = [0, 96], sizes = [8, 32], strides = [1, 1]} : vector<8x128xf32> to vector<8x32xf32>
    %198 = arith.mulf %191, %176 : vector<8x32xf32>
    %199 = arith.mulf %190, %196 : vector<8x32xf32>
    %200 = arith.addf %198, %199 : vector<8x32xf32>
    %201 = math.tanh %200 : vector<8x32xf32>
    %202 = arith.mulf %197, %201 : vector<8x32xf32>
    %c8_i32_62 = arith.constant 8 : i32
    %203 = arith.muli %arg0, %c8_i32_62 : i32
    %204 = arith.addi %203, %c5_i32 : i32
    %c8_i32_63 = arith.constant 8 : i32
    %205 = arith.cmpi slt, %204, %c8_i32_63 : i32
    %206 = arith.select %205, %202, %175 : vector<8x32xf32>
    %207 = arith.select %205, %200, %176 : vector<8x32xf32>
    %c6_i32 = arith.constant 6 : i32
    %c8_i32_64 = arith.constant 8 : i32
    %208 = arith.muli %c6_i32, %c8_i32_64 : i32
    %209 = tpu.assume_multiple %208, 8 : i32
    %210 = arith.index_cast %209 : i32 to index
    %c0_65 = arith.constant 0 : index
    %211 = vector.load %arg8[%210, %c0_65] : memref<64x128xf32, #tpu.memory_space<vmem>>, vector<8x128xf32>
    %cst_66 = arith.constant dense<0.000000e+00> : vector<8x128xf32>
    %212 = tpu.matmul %206, %10, %cst_66 {dimension_numbers = #tpu.dot_dimension_numbers<[1], [0], [0], [1], [0, 0, 1, 1], [], []>} : vector<8x32xf32>, vector<32x128xf32>, vector<8x128xf32> -> vector<8x128xf32>
    %213 = arith.addf %211, %212 : vector<8x128xf32>
    %214 = vector.broadcast %19 : vector<1x128xf32> to vector<8x128xf32>
    %215 = arith.mulf %213, %214 : vector<8x128xf32>
    %216 = arith.negf %215 : vector<8x128xf32>
    %217 = math.exp %216 : vector<8x128xf32>
    %cst_67 = arith.constant 1.000000e+00 : f32
    %218 = vector.broadcast %cst_67 : f32 to vector<8x128xf32>
    %219 = arith.addf %218, %217 : vector<8x128xf32>
    %220 = arith.divf %218, %219 : vector<8x128xf32>
    %221 = vector.extract_strided_slice %220 {offsets = [0, 0], sizes = [8, 32], strides = [1, 1]} : vector<8x128xf32> to vector<8x32xf32>
    %222 = vector.extract_strided_slice %220 {offsets = [0, 32], sizes = [8, 32], strides = [1, 1]} : vector<8x128xf32> to vector<8x32xf32>
    %223 = vector.extract_strided_slice %220 {offsets = [0, 64], sizes = [8, 32], strides = [1, 1]} : vector<8x128xf32> to vector<8x32xf32>
    %cst_68 = arith.constant 2.000000e+00 : f32
    %224 = vector.broadcast %cst_68 : f32 to vector<8x32xf32>
    %225 = arith.mulf %224, %223 : vector<8x32xf32>
    %cst_69 = arith.constant 1.000000e+00 : f32
    %226 = vector.broadcast %cst_69 : f32 to vector<8x32xf32>
    %227 = arith.subf %225, %226 : vector<8x32xf32>
    %228 = vector.extract_strided_slice %220 {offsets = [0, 96], sizes = [8, 32], strides = [1, 1]} : vector<8x128xf32> to vector<8x32xf32>
    %229 = arith.mulf %222, %207 : vector<8x32xf32>
    %230 = arith.mulf %221, %227 : vector<8x32xf32>
    %231 = arith.addf %229, %230 : vector<8x32xf32>
    %232 = math.tanh %231 : vector<8x32xf32>
    %233 = arith.mulf %228, %232 : vector<8x32xf32>
    %c8_i32_70 = arith.constant 8 : i32
    %234 = arith.muli %arg0, %c8_i32_70 : i32
    %235 = arith.addi %234, %c6_i32 : i32
    %c8_i32_71 = arith.constant 8 : i32
    %236 = arith.cmpi slt, %235, %c8_i32_71 : i32
    %237 = arith.select %236, %233, %206 : vector<8x32xf32>
    %238 = arith.select %236, %231, %207 : vector<8x32xf32>
    %c7_i32 = arith.constant 7 : i32
    %c8_i32_72 = arith.constant 8 : i32
    %239 = arith.muli %c7_i32, %c8_i32_72 : i32
    %240 = tpu.assume_multiple %239, 8 : i32
    %241 = arith.index_cast %240 : i32 to index
    %c0_73 = arith.constant 0 : index
    %242 = vector.load %arg8[%241, %c0_73] : memref<64x128xf32, #tpu.memory_space<vmem>>, vector<8x128xf32>
    %cst_74 = arith.constant dense<0.000000e+00> : vector<8x128xf32>
    %243 = tpu.matmul %237, %10, %cst_74 {dimension_numbers = #tpu.dot_dimension_numbers<[1], [0], [0], [1], [0, 0, 1, 1], [], []>} : vector<8x32xf32>, vector<32x128xf32>, vector<8x128xf32> -> vector<8x128xf32>
    %244 = arith.addf %242, %243 : vector<8x128xf32>
    %245 = vector.broadcast %19 : vector<1x128xf32> to vector<8x128xf32>
    %246 = arith.mulf %244, %245 : vector<8x128xf32>
    %247 = arith.negf %246 : vector<8x128xf32>
    %248 = math.exp %247 : vector<8x128xf32>
    %cst_75 = arith.constant 1.000000e+00 : f32
    %249 = vector.broadcast %cst_75 : f32 to vector<8x128xf32>
    %250 = arith.addf %249, %248 : vector<8x128xf32>
    %251 = arith.divf %249, %250 : vector<8x128xf32>
    %252 = vector.extract_strided_slice %251 {offsets = [0, 0], sizes = [8, 32], strides = [1, 1]} : vector<8x128xf32> to vector<8x32xf32>
    %253 = vector.extract_strided_slice %251 {offsets = [0, 32], sizes = [8, 32], strides = [1, 1]} : vector<8x128xf32> to vector<8x32xf32>
    %254 = vector.extract_strided_slice %251 {offsets = [0, 64], sizes = [8, 32], strides = [1, 1]} : vector<8x128xf32> to vector<8x32xf32>
    %cst_76 = arith.constant 2.000000e+00 : f32
    %255 = vector.broadcast %cst_76 : f32 to vector<8x32xf32>
    %256 = arith.mulf %255, %254 : vector<8x32xf32>
    %cst_77 = arith.constant 1.000000e+00 : f32
    %257 = vector.broadcast %cst_77 : f32 to vector<8x32xf32>
    %258 = arith.subf %256, %257 : vector<8x32xf32>
    %259 = vector.extract_strided_slice %251 {offsets = [0, 96], sizes = [8, 32], strides = [1, 1]} : vector<8x128xf32> to vector<8x32xf32>
    %260 = arith.mulf %253, %238 : vector<8x32xf32>
    %261 = arith.mulf %252, %258 : vector<8x32xf32>
    %262 = arith.addf %260, %261 : vector<8x32xf32>
    %263 = math.tanh %262 : vector<8x32xf32>
    %264 = arith.mulf %259, %263 : vector<8x32xf32>
    %c8_i32_78 = arith.constant 8 : i32
    %265 = arith.muli %arg0, %c8_i32_78 : i32
    %266 = arith.addi %265, %c7_i32 : i32
    %c8_i32_79 = arith.constant 8 : i32
    %267 = arith.cmpi slt, %266, %c8_i32_79 : i32
    %268 = arith.select %267, %264, %237 : vector<8x32xf32>
    %269 = arith.select %267, %262, %238 : vector<8x32xf32>
    %c8_i32_80 = arith.constant 8 : i32
    %c0_81 = arith.constant 0 : index
    %c0_82 = arith.constant 0 : index
    %270 = vector.load %arg9[%c0_81, %c0_82] : memref<8x32xf32, #tpu.memory_space<vmem>>, vector<8x32xf32>
    tpu.vector_store %arg9[%c0_81, %c0_82], %268 {strides = array<i32>} : memref<8x32xf32, #tpu.memory_space<vmem>>, vector<8x32xf32>,
    %c0_83 = arith.constant 0 : index
    %c0_84 = arith.constant 0 : index
    %271 = vector.load %arg10[%c0_83, %c0_84] : memref<8x32xf32, #tpu.memory_space<vmem>>, vector<8x32xf32>
    tpu.vector_store %arg10[%c0_83, %c0_84], %269 {strides = array<i32>} : memref<8x32xf32, #tpu.memory_space<vmem>>, vector<8x32xf32>,
    %c0_i32_85 = arith.constant 0 : i32
    %272 = arith.cmpi eq, %arg0, %c0_i32_85 : i32
    %273 = arith.extui %272 : i1 to i32
    %c0_i32_86 = arith.constant 0 : i32
    %274 = arith.cmpi ne, %273, %c0_i32_86 : i32
    scf.if %274 {
      %c0_87 = arith.constant 0 : index
      %c0_88 = arith.constant 0 : index
      %275 = vector.load %arg5[%c0_87, %c0_88] : memref<32x128xf32, #tpu.memory_space<vmem>>, vector<32x128xf32>
      %cst_89 = arith.constant dense<0.000000e+00> : vector<8x128xf32>
      %276 = tpu.matmul %268, %275, %cst_89 {dimension_numbers = #tpu.dot_dimension_numbers<[1], [0], [0], [1], [0, 0, 1, 1], [], []>} : vector<8x32xf32>, vector<32x128xf32>, vector<8x128xf32> -> vector<8x128xf32>
      %c0_90 = arith.constant 0 : index
      %c0_91 = arith.constant 0 : index
      %277 = vector.load %arg6[%c0_90, %c0_91] : memref<1x128xf32, #tpu.memory_space<vmem>>, vector<1x128xf32>
      %278 = vector.broadcast %277 : vector<1x128xf32> to vector<8x128xf32>
      %279 = arith.addf %276, %278 : vector<8x128xf32>
      %c0_92 = arith.constant 0 : index
      %c0_93 = arith.constant 0 : index
      %280 = vector.load %arg7[%c0_92, %c0_93] : memref<8x128xf32, #tpu.memory_space<vmem>>, vector<8x128xf32>
      tpu.vector_store %arg7[%c0_92, %c0_93], %279 {strides = array<i32>} : memref<8x128xf32, #tpu.memory_space<vmem>>, vector<8x128xf32>,
    } else {
    }
    return
  }
  func.func @transform_0(%arg0: i32) -> (i32, i32) {
    %c0_i32 = arith.constant 0 : i32
    %c0_i32_0 = arith.constant 0 : i32
    return %arg0, %c0_i32 : i32, i32
  }
  func.func @transform_1(%arg0: i32) -> (i32, i32) {
    %c0_i32 = arith.constant 0 : i32
    %c0_i32_0 = arith.constant 0 : i32
    %c0_i32_1 = arith.constant 0 : i32
    return %c0_i32, %c0_i32_0 : i32, i32
  }
  func.func @transform_2(%arg0: i32) -> (i32, i32) {
    %c0_i32 = arith.constant 0 : i32
    %c0_i32_0 = arith.constant 0 : i32
    %c0_i32_1 = arith.constant 0 : i32
    return %c0_i32, %c0_i32_0 : i32, i32
  }
  func.func @transform_3(%arg0: i32) -> (i32, i32) {
    %c0_i32 = arith.constant 0 : i32
    %c0_i32_0 = arith.constant 0 : i32
    %c0_i32_1 = arith.constant 0 : i32
    return %c0_i32, %c0_i32_0 : i32, i32
  }
  func.func @transform_4(%arg0: i32) -> (i32, i32) {
    %c0_i32 = arith.constant 0 : i32
    %c0_i32_0 = arith.constant 0 : i32
    %c0_i32_1 = arith.constant 0 : i32
    return %c0_i32, %c0_i32_0 : i32, i32
  }
  func.func @transform_5(%arg0: i32) -> (i32, i32) {
    %c0_i32 = arith.constant 0 : i32
    %c0_i32_0 = arith.constant 0 : i32
    %c0_i32_1 = arith.constant 0 : i32
    return %c0_i32, %c0_i32_0 : i32, i32
  }
  func.func @transform_6(%arg0: i32) -> (i32, i32) {
    %c0_i32 = arith.constant 0 : i32
    %c0_i32_0 = arith.constant 0 : i32
    %c0_i32_1 = arith.constant 0 : i32
    return %c0_i32, %c0_i32_0 : i32, i32
  }
}

</mosaic_0001>

<bundles_post_ra>
// kernel: tpu_custom_call.1
= control target key start
LH: loop header
LB: loop body
LE: loop exit
PB: predicated region body
PF: predicated region fallthrough
CT: control target
= control target key end

     0   :  { %vm28_vm0 = vcmask 261120   ;;  %v1491_v3 = vmov 0.0   ;;  %s1784_s0 = inlined_call_operand.vmem [shape: f32[64,32], index: 0, kind: input, shape index: {}]   ;;  %s1785_s1 = inlined_call_operand.vmem [shape: f32[32,128], index: 1, kind: input, shape index: {}]   ;;  %s1786_s2 = inlined_call_operand.vmem [shape: f32[32,128], index: 2, kind: input, shape index: {}]   ;;  %s1787_s3 = inlined_call_operand.vmem [shape: f32[1,128], index: 3, kind: input, shape index: {}]   ;;  %s1788_s4 = inlined_call_operand.vmem [shape: f32[32,128], index: 4, kind: input, shape index: {}]   ;;  %s1789_s5 = inlined_call_operand.vmem [shape: f32[1,128], index: 5, kind: input, shape index: {}]   ;;  %s1790_s6 = inlined_call_operand.hbm [shape: f32[8,128], index: 6, kind: output, shape index: {}]  }
   0x1   :  { %v42_v0 = vld [vmem:[%s1785_s1 + $0x18] sm:$0xff]  ;;  %v41_v1 = vld [vmem:[%s1785_s1 + $0x10] sm:$0xff]  ;;  %1315 = vmatprep.subr.mxu1 %v1491_v3  ;;  %29 = vst.msk [vmem:[#allocation3] sm:$0xff] %vm28_vm0, %v1491_v3  ;;  %30 = vst.msk [vmem:[#allocation4] sm:$0xff] %vm28_vm0, %v1491_v3 }
   0x2   :  { %v1542_v2 = vld [vmem:[%s1786_s2 + $0x18] sm:$0xff]  ;;  %1295 = vmatprep.subr.mxu0 %v42_v0  ;;  %v1548_v4 = vld [vmem:[%s1786_s2 + $0x10] sm:$0xff]  ;;  %v40_v5 = vld [vmem:[%s1785_s1 + $0x8] sm:$0xff] }
   0x3   :  { %1296 = vmatpush3.msra.mxu0 %v42_v0  ;;  %1316 = vmatpush3.msra.mxu1 %v1542_v2  ;;  %v31_v6 = vld [vmem:[%s1784_s0] sm:$0xff] }
   0x4   :  { %1297 = vmatprep.subr.mxu0 %v41_v1  ;;  %1317 = vmatprep.subr.mxu1 %v1491_v3 }
   0x5   :  { %11 = vsyncpa [#allocation6], 0  ;;  %1298 = vmatpush3.msra.mxu0 %v41_v1  ;;  %1318 = vmatpush3.msra.mxu1 %v1548_v4  ;;  %v39_v7 = vld [vmem:[%s1785_s1] sm:$0xff]  ;;  %v1569_v8 = vld [vmem:[%s1786_s2 + $0x8] sm:$0xff]  ;;  %vm1492_vm1 = vmmov 0   ;;  %v192_v12 = vlaneseq  ;;  %v1493_v19 = vmov 1.0  }
   0x6   :  { %1299 = vmatprep.subr.mxu0 %v40_v5  ;;  %1319 = vmatprep.subr.mxu1 %v1491_v3  ;;  %v32_v9 = vld [vmem:[%s1784_s0 + $0x8] sm:$0xff]  ;;  %v1579_v10 = vld [vmem:[%s1786_s2] sm:$0xff]  ;;  %s1495_s17 = smov 32   ;;  %v33_v57 = vld [vmem:[%s1784_s0 + $0x10] sm:$0xff]  ;;  %s1496_s13 = smov 96  }
   0x7   :  { %1300 = vmatpush3.msra.mxu0 %v40_v5  ;;  %1303 = vmatprep.mubr.msk.f32.mxu0 %vm28_vm0, %v31_v6  ;;  %v193_v13 = vand.u32 127, %v192_v12  ;;  %v1611_v15 = vld [vmem:[%s1787_s3] ss:$0 sm:$0xff]  ;;  %s1494_s3 = smov 64   ;;  %v34_v58 = vld [vmem:[%s1784_s0 + $0x18] sm:$0xff]  ;;  %v36_v60 = vld [vmem:[%s1784_s0 + $0x28] sm:$0xff] }
   0x8   :  { %1301 = vmatprep.subr.mxu0 %v39_v7  ;;  %1320 = vmatpush3.msra.mxu1 %v1569_v8  ;;  %v198_v11 = vld [vmem:[#allocation3] sm:$0xff]  ;;  %v199_v30 = vld [vmem:[#allocation4] sm:$0xff]  ;;  %v37_v61 = vld [vmem:[%s1784_s0 + $0x30] sm:$0xff]  ;;  %s1497_s15 = smov [#allocation5]  }
   0x9   :  { %1302 = vmatpush3.msra.mxu0 %v39_v7  ;;  %1321 = vmatprep.subr.mxu1 %v1491_v3  ;;  %vm194_vm2 = vcmp.ge.s32.totalorder %v193_v13, 64  ;;  %vm195_vm3 = vcmp.lt.s32.totalorder %v193_v13, 96  ;;  %v35_v59 = vld [vmem:[%s1784_s0 + $0x20] sm:$0xff]  ;;  %v38_v62 = vld [vmem:[%s1784_s0 + $0x38] sm:$0xff]  ;;  %s1195_s16 = sshll.u32 %s1497_s15, 4  ;;  %s1196_s16 = int_to_ptr.vmem [resolvable:$true] %s1195_s16 }
   0xa   :  { %1304 = vmatmul.mubr.msk.f32.vlgmr.msra.gmra.mxu0 %vm28_vm0, %v32_v9  ;;  %1322 = vmatpush3.msra.mxu1 %v1579_v10  ;;  %vm196_vm4 = vmand %vm194_vm2, %vm195_vm3  ;;  %s1469_s1 = scalar_lea.vmem %s1196_s16, 128  ;;  %p1474_p1 = scmp.lt.s32.totalorder %s1196_s16, %s1196_s16 }
   0xb   :  { %1323 = vmatprep.mubr.msk.f32.mxu1 %vm1492_vm1, %v1491_v3  ;;  %1326 = vmatprep.subr.mxu1 %v1491_v3  ;;  %v1614_v20 = vsel %vm196_vm4, 2.0, %v1493_v19  ;;  %p1470_p0 = scmp.ne.s32.totalorder %s1196_s16, %s1469_s1  ;;  %p1475_p2 = scmp.lt.s32.totalorder %s1469_s1, %s1469_s1 }
   0xc   :  { %1324 = vmatmul.mubr.msk.f32.vlgmr.msra.gmra.mxu1 %vm28_vm0, %v198_v11  ;;  %1337 = vmatprep.subr.mxu0 %v1491_v3 }
   0xd   :  { %1327 = vmatpush3.msra.mxu1 %v1542_v2  ;;  %1334 = vmatprep.mubr.msk.f32.mxu1 %vm1492_vm1, %v1491_v3  ;;  %p1476_p3 = por %p1475_p2, %p1474_p1 }
   0xe   :  { %1328 = vmatprep.subr.mxu1 %v1491_v3  ;;  %1338 = vmatpush3.msra.mxu0 %v1542_v2 }
   0xf   :  { %1329 = vmatpush3.msra.mxu1 %v1548_v4  ;;  %1339 = vmatprep.subr.mxu0 %v1491_v3  ;;  %p1477_p4 = pnand %p1476_p3, %p1470_p0 }
  0x10   :  { %1330 = vmatprep.subr.mxu1 %v1491_v3  ;;  %1340 = vmatpush3.msra.mxu0 %v1548_v4 }
  0x11   :  { %1331 = vmatpush3.msra.mxu1 %v1569_v8  ;;  %1341 = vmatprep.subr.mxu0 %v1491_v3 }
  0x12   :  { %1332 = vmatprep.subr.mxu1 %v1491_v3  ;;  %1342 = vmatpush3.msra.mxu0 %v1569_v8 }
  0x13   :  { %1333 = vmatpush3.msra.mxu1 %v1579_v10  ;;  %1343 = vmatprep.subr.mxu0 %v1491_v3 }
  0x14   :  { %1344 = vmatpush3.msra.mxu0 %v1579_v10  ;;  %1348 = vmatprep.subr.mxu1 %v1491_v3 }
  0x15   :  { %1359 = vmatprep.subr.mxu0 %v1491_v3  ;;  %1306 = vmatprep.mubr.msk.f32.mxu0 %vm28_vm0, %v33_v57 }
  0x16   :  { %1307 = vmatmul.mubr.msk.f32.gmra.mxu0 %vm28_vm0, %v34_v58 }
  0x17   :  { %1309 = vmatprep.mubr.msk.f32.mxu0 %vm28_vm0, %v35_v59 }
  0x1a   :  { %1310 = vmatmul.mubr.msk.f32.gmra.mxu0 %vm28_vm0, %v36_v60 }
  0x1b   :  { %1312 = vmatprep.mubr.msk.f32.mxu0 %vm28_vm0, %v37_v61 }
  0x1e   :  { %1313 = vmatmul.mubr.msk.f32.gmra.mxu0 %vm28_vm0, %v38_v62 }
  0x1f   :  { %1345 = vmatprep.mubr.msk.f32.mxu0 %vm1492_vm1, %v1491_v3 }
  0xca   :  { %v1305_v14 = vpop.f32.mrf.mxu0 }
  0xcb   :  { %v147_v41 = vadd.f32 %v1305_v14, %v1611_v15 }
  0xcc   :  { %v141_v16 = vpop.f32.mrf.mxu0  ;;  %v270_v17 = vpop.f32.mrf.mxu1 }
  0xcd   :  { %v142_v18 = vadd.f32 %v1611_v15, %v141_v16 }
  0xce   :  { %v1325_v21 = vpop.f32.mrf.mxu1 }
  0xcf   :  { %v274_v22 = vadd.f32 %v270_v17, %v142_v18 }
  0xd1   :  { %v275_v23 = vmul.f32 %v274_v22, %v1614_v20 }
  0xd3   :  { %v1213_v24 = vmul.f32 -1.442695, %v275_v23 }
  0xd5   :  { %1421 = vpow2.f32 %v1213_v24 }
  0xd6   :  { %v1308_v6 = vpop.f32.mrf.mxu0 }
  0xd8   :  { %v151_v7 = vpop.f32.mrf.mxu0 }
  0xd9   :  { %v152_v14 = vadd.f32 %v1611_v15, %v151_v7 }
  0xda   :  { %v1676_v9 = vpop.f32.mrf.mxu0 }
  0xdc   :  { %v1678_v11 = vpop.f32.mrf.mxu0 }
  0xde   :  { %v1680_v12 = vpop.f32.mrf.mxu0 }
  0xe0   :  { %v1682_v13 = vpop.f32.mrf.mxu0 }
  0xe2   :  { %v1422_v25 = vpop.eup %1421 }
  0xe3   :  { %v279_v26 = vadd.f32 1.0, %v1422_v25 }
  0xe5   :  { %1423 = vrcp.f32 %v279_v26 }
  0xf2   :  { %v1424_v27 = vpop.eup %1423 }
  0xf3   :  { %v282_v28 = vmul.f32 2.0, %v1424_v27 }
  0xf5   :  { %v1214_v29 = vadd.f32 -1.0, %v282_v28 }
  0xf7   :  { %290 = vrot.lane.b32.xlu0 %v1214_v29, %s1494_s3 }
  0xfb   :  { %285 = vrot.lane.b32.xlu0 %v199_v30, %s1495_s17 }
 0x169   :  { %v291_v31 = vpop.permute.xlu0 %290 }
 0x16a   :  { %v293_v32 = vmul.f32 %v1424_v27, %v291_v31 }
 0x16c   :  { %295 = vrot.lane.b32.xlu1 %v293_v32, %s1495_s17 }
 0x16d   :  { %v286_v33 = vpop.permute.xlu0 %285 }
 0x16e   :  { %v288_v34 = vmul.f32 %v1424_v27, %v286_v33 }
 0x1de   :  { %v296_v35 = vpop.permute.xlu1 %295 }
 0x1df   :  { %v298_v36 = vadd.f32 %v296_v35, %v288_v34 }
 0x1e1   :  { %1425 = vtanh.f32 %v298_v36 }
 0x1ee   :  { %v1426_v37 = vpop.eup %1425 }
 0x1ef   :  { %301 = vrot.lane.b32.xlu1 %v1426_v37, %s1494_s3 }
 0x261   :  { %v302_v38 = vpop.permute.xlu1 %301 }
 0x262   :  { %v304_v39 = vmul.f32 %v1424_v27, %v302_v38 }
 0x264   :  { %318 = vrot.lane.b32.xlu0 %v304_v39, %s1495_s17 }
 0x2d6   :  { %v319_v40 = vpop.permute.xlu0 %318 }
 0x2d7   :  { %1335 = vmatmul.mubr.msk.f32.vlgmr.msra.gmra.mxu1 %vm28_vm0, %v319_v40 }
 0x2d8   :  { %1349 = vmatpush3.msra.mxu1 %v1542_v2  ;;  %1356 = vmatprep.mubr.msk.f32.mxu1 %vm1492_vm1, %v1491_v3 }
 0x2d9   :  { %1350 = vmatprep.subr.mxu1 %v1491_v3 }
 0x2da   :  { %1351 = vmatpush3.msra.mxu1 %v1548_v4 }
 0x2db   :  { %1352 = vmatprep.subr.mxu1 %v1491_v3 }
 0x2dc   :  { %1353 = vmatpush3.msra.mxu1 %v1569_v8 }
 0x2dd   :  { %1354 = vmatprep.subr.mxu1 %v1491_v3 }
 0x2de   :  { %1355 = vmatpush3.msra.mxu1 %v1579_v10 }
 0x2df   :  { %1370 = vmatprep.subr.mxu1 %v1491_v3 }
 0x397   :  { %v388_v42 = vpop.f32.mrf.mxu1 }
 0x398   :  { %v392_v43 = vadd.f32 %v388_v42, %v147_v41 }
 0x399   :  { %v1336_v44 = vpop.f32.mrf.mxu1 }
 0x39a   :  { %v393_v45 = vmul.f32 %v392_v43, %v1614_v20 }
 0x39c   :  { %v1216_v46 = vmul.f32 -1.442695, %v393_v45 }
 0x39e   :  { %1427 = vpow2.f32 %v1216_v46 }
 0x3ab   :  { %v1428_v47 = vpop.eup %1427 }
 0x3ac   :  { %v397_v48 = vadd.f32 1.0, %v1428_v47 }
 0x3ae   :  { %1429 = vrcp.f32 %v397_v48 }
 0x3bb   :  { %v1430_v49 = vpop.eup %1429 }
 0x3bc   :  { %v400_v50 = vmul.f32 2.0, %v1430_v49  ;;  %v402_v54 = vmul.f32 %v1430_v49, %v298_v36  ;;  %v157_v36 = vadd.f32 %v1308_v6, %v1611_v15 }
 0x3be   :  { %v1217_v51 = vadd.f32 -1.0, %v400_v50 }
 0x3c0   :  { %404 = vrot.lane.b32.xlu1 %v1217_v51, %s1494_s3 }
 0x432   :  { %v405_v52 = vpop.permute.xlu1 %404 }
 0x433   :  { %v407_v53 = vmul.f32 %v1430_v49, %v405_v52 }
 0x435   :  { %409 = vrot.lane.b32.xlu0 %v407_v53, %s1495_s17 }
 0x4a7   :  { %v410_v55 = vpop.permute.xlu0 %409 }
 0x4a8   :  { %v412_v56 = vadd.f32 %v410_v55, %v402_v54 }
 0x4aa   :  { %1431 = vtanh.f32 %v412_v56 }
 0x4b7   :  { %v1432_v63 = vpop.eup %1431 }
 0x4b8   :  { %415 = vrot.lane.b32.xlu1 %v1432_v63, %s1494_s3 }
 0x52a   :  { %v416_v0 = vpop.permute.xlu1 %415 }
 0x52b   :  { %v418_v1 = vmul.f32 %v1430_v49, %v416_v0 }
 0x52d   :  { %429 = vrot.lane.b32.xlu0 %v418_v1, %s1495_s17 }
 0x59f   :  { %v430_v5 = vpop.permute.xlu0 %429 }
 0x5a0   :  { %1346 = vmatmul.mubr.msk.f32.vlgmr.msra.gmra.mxu0 %vm28_vm0, %v430_v5 }
 0x5a1   :  { %1360 = vmatpush3.msra.mxu0 %v1542_v2  ;;  %1367 = vmatprep.mubr.msk.f32.mxu0 %vm1492_vm1, %v1491_v3 }
 0x5a2   :  { %1361 = vmatprep.subr.mxu0 %v1491_v3 }
 0x5a3   :  { %1362 = vmatpush3.msra.mxu0 %v1548_v4 }
 0x5a4   :  { %1363 = vmatprep.subr.mxu0 %v1491_v3 }
 0x5a5   :  { %1364 = vmatpush3.msra.mxu0 %v1569_v8 }
 0x5a6   :  { %1365 = vmatprep.subr.mxu0 %v1491_v3 }
 0x5a7   :  { %1366 = vmatpush3.msra.mxu0 %v1579_v10 }
 0x5a8   :  { %1381 = vmatprep.subr.mxu0 %v1491_v3 }
 0x660   :  { %v499_v16 = vpop.f32.mrf.mxu0 }
 0x661   :  { %v503_v17 = vadd.f32 %v499_v16, %v152_v14 }
 0x662   :  { %v1347_v18 = vpop.f32.mrf.mxu0 }
 0x663   :  { %v504_v19 = vmul.f32 %v503_v17, %v1614_v20 }
 0x665   :  { %v1219_v21 = vmul.f32 -1.442695, %v504_v19 }
 0x667   :  { %1433 = vpow2.f32 %v1219_v21 }
 0x674   :  { %v1434_v22 = vpop.eup %1433 }
 0x675   :  { %v508_v23 = vadd.f32 1.0, %v1434_v22  ;;  %v167_v22 = vadd.f32 %v1676_v9, %v1611_v15 }
 0x677   :  { %1435 = vrcp.f32 %v508_v23 }
 0x684   :  { %v1436_v24 = vpop.eup %1435 }
 0x685   :  { %v511_v25 = vmul.f32 2.0, %v1436_v24  ;;  %v513_v29 = vmul.f32 %v1436_v24, %v412_v56  ;;  %v162_v56 = vadd.f32 %v1611_v15, %v1678_v11 }
 0x687   :  { %v1220_v26 = vadd.f32 -1.0, %v511_v25 }
 0x689   :  { %515 = vrot.lane.b32.xlu1 %v1220_v26, %s1494_s3 }
 0x6fb   :  { %v516_v27 = vpop.permute.xlu1 %515 }
 0x6fc   :  { %v518_v28 = vmul.f32 %v1436_v24, %v516_v27 }
 0x6fe   :  { %520 = vrot.lane.b32.xlu0 %v518_v28, %s1495_s17 }
 0x770   :  { %v521_v30 = vpop.permute.xlu0 %520 }
 0x771   :  { %v523_v31 = vadd.f32 %v521_v30, %v513_v29 }
 0x773   :  { %1437 = vtanh.f32 %v523_v31 }
 0x780   :  { %v1438_v32 = vpop.eup %1437 }
 0x781   :  { %526 = vrot.lane.b32.xlu1 %v1438_v32, %s1494_s3 }
 0x7f3   :  { %v527_v33 = vpop.permute.xlu1 %526 }
 0x7f4   :  { %v529_v34 = vmul.f32 %v1436_v24, %v527_v33 }
 0x7f6   :  { %540 = vrot.lane.b32.xlu0 %v529_v34, %s1495_s17 }
 0x868   :  { %v541_v35 = vpop.permute.xlu0 %540 }
 0x869   :  { %1357 = vmatmul.mubr.msk.f32.vlgmr.msra.gmra.mxu1 %vm28_vm0, %v541_v35 }
 0x86a   :  { %1371 = vmatpush3.msra.mxu1 %v1542_v2  ;;  %1378 = vmatprep.mubr.msk.f32.mxu1 %vm1492_vm1, %v1491_v3 }
 0x86b   :  { %1372 = vmatprep.subr.mxu1 %v1491_v3 }
 0x86c   :  { %1373 = vmatpush3.msra.mxu1 %v1548_v4 }
 0x86d   :  { %1374 = vmatprep.subr.mxu1 %v1491_v3 }
 0x86e   :  { %1375 = vmatpush3.msra.mxu1 %v1569_v8 }
 0x86f   :  { %1376 = vmatprep.subr.mxu1 %v1491_v3 }
 0x870   :  { %1377 = vmatpush3.msra.mxu1 %v1579_v10 }
 0x871   :  { %1392 = vmatprep.subr.mxu1 %v1491_v3 }
 0x929   :  { %v610_v37 = vpop.f32.mrf.mxu1 }
 0x92a   :  { %v614_v38 = vadd.f32 %v610_v37, %v157_v36  ;;  %v172_v37 = vadd.f32 %v1611_v15, %v1682_v13 }
 0x92b   :  { %v1358_v39 = vpop.f32.mrf.mxu1 }
 0x92c   :  { %v615_v40 = vmul.f32 %v614_v38, %v1614_v20 }
 0x92e   :  { %v1222_v41 = vmul.f32 -1.442695, %v615_v40 }
 0x930   :  { %1439 = vpow2.f32 %v1222_v41 }
 0x93d   :  { %v1440_v42 = vpop.eup %1439 }
 0x93e   :  { %v619_v43 = vadd.f32 1.0, %v1440_v42 }
 0x940   :  { %1441 = vrcp.f32 %v619_v43 }
 0x94d   :  { %v1442_v44 = vpop.eup %1441 }
 0x94e   :  { %v622_v45 = vmul.f32 2.0, %v1442_v44  ;;  %v624_v49 = vmul.f32 %v1442_v44, %v523_v31 }
 0x950   :  { %v1223_v46 = vadd.f32 -1.0, %v622_v45 }
 0x952   :  { %626 = vrot.lane.b32.xlu1 %v1223_v46, %s1494_s3 }
 0x9c4   :  { %v627_v47 = vpop.permute.xlu1 %626 }
 0x9c5   :  { %v629_v48 = vmul.f32 %v1442_v44, %v627_v47 }
 0x9c7   :  { %631 = vrot.lane.b32.xlu0 %v629_v48, %s1495_s17 }
 0xa39   :  { %v632_v50 = vpop.permute.xlu0 %631 }
 0xa3a   :  { %v634_v51 = vadd.f32 %v632_v50, %v624_v49 }
 0xa3c   :  { %1443 = vtanh.f32 %v634_v51 }
 0xa49   :  { %v1444_v52 = vpop.eup %1443 }
 0xa4a   :  { %637 = vrot.lane.b32.xlu1 %v1444_v52, %s1494_s3 }
 0xabc   :  { %v638_v53 = vpop.permute.xlu1 %637 }
 0xabd   :  { %v640_v54 = vmul.f32 %v1442_v44, %v638_v53 }
 0xabf   :  { %651 = vrot.lane.b32.xlu0 %v640_v54, %s1495_s17 }
 0xb31   :  { %v652_v55 = vpop.permute.xlu0 %651 }
 0xb32   :  { %1368 = vmatmul.mubr.msk.f32.vlgmr.msra.gmra.mxu0 %vm28_vm0, %v652_v55 }
 0xb33   :  { %1382 = vmatpush3.msra.mxu0 %v1542_v2  ;;  %1389 = vmatprep.mubr.msk.f32.mxu0 %vm1492_vm1, %v1491_v3 }
 0xb34   :  { %1383 = vmatprep.subr.mxu0 %v1491_v3 }
 0xb35   :  { %1384 = vmatpush3.msra.mxu0 %v1548_v4 }
 0xb36   :  { %1385 = vmatprep.subr.mxu0 %v1491_v3 }
 0xb37   :  { %1386 = vmatpush3.msra.mxu0 %v1569_v8 }
 0xb38   :  { %1387 = vmatprep.subr.mxu0 %v1491_v3 }
 0xb39   :  { %1388 = vmatpush3.msra.mxu0 %v1579_v10 }
 0xb3a   :  { %1403 = vmatprep.subr.mxu0 %v1491_v3 }
 0xbf2   :  { %v721_v57 = vpop.f32.mrf.mxu0 }
 0xbf3   :  { %v725_v58 = vadd.f32 %v721_v57, %v162_v56  ;;  %v177_v56 = vadd.f32 %v1680_v12, %v1611_v15 }
 0xbf4   :  { %v1369_v59 = vpop.f32.mrf.mxu0 }
 0xbf5   :  { %v726_v60 = vmul.f32 %v725_v58, %v1614_v20 }
 0xbf7   :  { %v1225_v61 = vmul.f32 -1.442695, %v726_v60 }
 0xbf9   :  { %1445 = vpow2.f32 %v1225_v61 }
 0xc06   :  { %v1446_v62 = vpop.eup %1445 }
 0xc07   :  { %v730_v63 = vadd.f32 1.0, %v1446_v62 }
 0xc09   :  { %1447 = vrcp.f32 %v730_v63 }
 0xc16   :  { %v1448_v0 = vpop.eup %1447 }
 0xc17   :  { %v733_v1 = vmul.f32 2.0, %v1448_v0  ;;  %v735_v11 = vmul.f32 %v1448_v0, %v634_v51 }
 0xc19   :  { %v1226_v5 = vadd.f32 -1.0, %v733_v1 }
 0xc1b   :  { %737 = vrot.lane.b32.xlu1 %v1226_v5, %s1494_s3 }
 0xc8d   :  { %v738_v6 = vpop.permute.xlu1 %737 }
 0xc8e   :  { %v740_v7 = vmul.f32 %v1448_v0, %v738_v6 }
 0xc90   :  { %742 = vrot.lane.b32.xlu0 %v740_v7, %s1495_s17 }
 0xd02   :  { %v743_v14 = vpop.permute.xlu0 %742 }
 0xd03   :  { %v745_v16 = vadd.f32 %v743_v14, %v735_v11  ;;  %v1107_v14 = vld [vmem:[%s1788_s4 + $0x10] sm:$0xff] }
 0xd05   :  { %1449 = vtanh.f32 %v745_v16 }
 0xd12   :  { %v1450_v17 = vpop.eup %1449 }
 0xd13   :  { %748 = vrot.lane.b32.xlu1 %v1450_v17, %s1494_s3  ;;  %v1105_v17 = vld [vmem:[%s1788_s4] sm:$0xff] }
 0xd85   :  { %v749_v18 = vpop.permute.xlu1 %748 }
 0xd86   :  { %v751_v19 = vmul.f32 %v1448_v0, %v749_v18 }
 0xd88   :  { %762 = vrot.lane.b32.xlu0 %v751_v19, %s1495_s17 }
 0xdfa   :  { %v763_v21 = vpop.permute.xlu0 %762 }
 0xdfb   :  { %1379 = vmatmul.mubr.msk.f32.vlgmr.msra.gmra.mxu1 %vm28_vm0, %v763_v21 }
 0xdfc   :  { %1393 = vmatpush3.msra.mxu1 %v1542_v2  ;;  %1400 = vmatprep.mubr.msk.f32.mxu1 %vm1492_vm1, %v1491_v3 }
 0xdfd   :  { %1394 = vmatprep.subr.mxu1 %v1491_v3 }
 0xdfe   :  { %1395 = vmatpush3.msra.mxu1 %v1548_v4 }
 0xdff   :  { %1396 = vmatprep.subr.mxu1 %v1491_v3 }
 0xe00   :  { %1397 = vmatpush3.msra.mxu1 %v1569_v8 }
 0xe01   :  { %1398 = vmatprep.subr.mxu1 %v1491_v3 }
 0xe02   :  { %1399 = vmatpush3.msra.mxu1 %v1579_v10 }
 0xebb   :  { %v832_v23 = vpop.f32.mrf.mxu1 }
 0xebc   :  { %v836_v2 = vadd.f32 %v832_v23, %v167_v22 }
 0xebd   :  { %v1380_v24 = vpop.f32.mrf.mxu1 }
 0xebe   :  { %v837_v25 = vmul.f32 %v836_v2, %v1614_v20 }
 0xec0   :  { %v1228_v26 = vmul.f32 -1.442695, %v837_v25 }
 0xec2   :  { %1451 = vpow2.f32 %v1228_v26 }
 0xecf   :  { %v1452_v27 = vpop.eup %1451 }
 0xed0   :  { %v841_v4 = vadd.f32 1.0, %v1452_v27 }
 0xed2   :  { %1453 = vrcp.f32 %v841_v4 }
 0xedf   :  { %v1454_v28 = vpop.eup %1453 }
 0xee0   :  { %v844_v29 = vmul.f32 2.0, %v1454_v28  ;;  %v846_v9 = vmul.f32 %v1454_v28, %v745_v16  ;;  %v1106_v16 = vld [vmem:[%s1788_s4 + $0x8] sm:$0xff] }
 0xee2   :  { %v1229_v8 = vadd.f32 -1.0, %v844_v29 }
 0xee4   :  { %848 = vrot.lane.b32.xlu1 %v1229_v8, %s1494_s3 }
 0xf56   :  { %v849_v30 = vpop.permute.xlu1 %848 }
 0xf57   :  { %v851_v10 = vmul.f32 %v1454_v28, %v849_v30 }
 0xf59   :  { %853 = vrot.lane.b32.xlu0 %v851_v10, %s1495_s17 }
 0xfcb   :  { %v854_v31 = vpop.permute.xlu0 %853 }
 0xfcc   :  { %v856_v32 = vadd.f32 %v854_v31, %v846_v9 }
 0xfce   :  { %1455 = vtanh.f32 %v856_v32 }
 0xfdb   :  { %v1456_v33 = vpop.eup %1455 }
 0xfdc   :  { %859 = vrot.lane.b32.xlu1 %v1456_v33, %s1494_s3 }
0x104e   :  { %v860_v34 = vpop.permute.xlu1 %859 }
0x104f   :  { %v862_v35 = vmul.f32 %v1454_v28, %v860_v34 }
0x1051   :  { %873 = vrot.lane.b32.xlu0 %v862_v35, %s1495_s17 }
0x10c3   :  { %v874_v36 = vpop.permute.xlu0 %873 }
0x10c4   :  { %1390 = vmatmul.mubr.msk.f32.vlgmr.msra.gmra.mxu0 %vm28_vm0, %v874_v36 }
0x10c5   :  { %1411 = vmatprep.mubr.msk.f32.mxu0 %vm1492_vm1, %v1491_v3 }
0x1184   :  { %v943_v38 = vpop.f32.mrf.mxu0 }
0x1185   :  { %v947_v39 = vadd.f32 %v943_v38, %v172_v37 }
0x1186   :  { %v1391_v40 = vpop.f32.mrf.mxu0 }
0x1187   :  { %v948_v41 = vmul.f32 %v947_v39, %v1614_v20 }
0x1189   :  { %v1231_v42 = vmul.f32 -1.442695, %v948_v41 }
0x118b   :  { %1457 = vpow2.f32 %v1231_v42 }
0x1198   :  { %v1458_v43 = vpop.eup %1457 }
0x1199   :  { %v952_v44 = vadd.f32 1.0, %v1458_v43 }
0x119b   :  { %1459 = vrcp.f32 %v952_v44 }
0x11a8   :  { %v1460_v45 = vpop.eup %1459 }
0x11a9   :  { %v955_v46 = vmul.f32 2.0, %v1460_v45  ;;  %v957_v13 = vmul.f32 %v1460_v45, %v856_v32 }
0x11ab   :  { %v1232_v47 = vadd.f32 -1.0, %v955_v46 }
0x11ad   :  { %959 = vrot.lane.b32.xlu1 %v1232_v47, %s1494_s3 }
0x121f   :  { %v960_v48 = vpop.permute.xlu1 %959 }
0x1220   :  { %v962_v49 = vmul.f32 %v1460_v45, %v960_v48 }
0x1222   :  { %964 = vrot.lane.b32.xlu0 %v962_v49, %s1495_s17 }
0x1294   :  { %v965_v50 = vpop.permute.xlu0 %964 }
0x1295   :  { %v967_v51 = vadd.f32 %v965_v50, %v957_v13 }
0x1297   :  { %1461 = vtanh.f32 %v967_v51 }
0x12a4   :  { %v1462_v52 = vpop.eup %1461 }
0x12a5   :  { %970 = vrot.lane.b32.xlu1 %v1462_v52, %s1494_s3 }
0x1317   :  { %v971_v53 = vpop.permute.xlu1 %970 }
0x1318   :  { %v973_v54 = vmul.f32 %v1460_v45, %v971_v53 }
0x131a   :  { %984 = vrot.lane.b32.xlu0 %v973_v54, %s1495_s17 }
0x138c   :  { %v985_v55 = vpop.permute.xlu0 %984 }
0x138d   :  { %1401 = vmatmul.mubr.msk.f32.vlgmr.msra.gmra.mxu1 %vm28_vm0, %v985_v55 }
0x144d   :  { %v1054_v57 = vpop.f32.mrf.mxu1 }
0x144e   :  { %v1058_v58 = vadd.f32 %v1054_v57, %v177_v56 }
0x144f   :  { %v1402_v59 = vpop.f32.mrf.mxu1 }
0x1450   :  { %v1059_v60 = vmul.f32 %v1058_v58, %v1614_v20  ;;  %v1108_v20 = vld [vmem:[%s1788_s4 + $0x18] sm:$0xff] }
0x1451   :  { %1404 = vmatpush3.msra.mxu0 %v1108_v20 }
0x1452   :  { %v1234_v61 = vmul.f32 -1.442695, %v1059_v60  ;;  %1405 = vmatprep.subr.mxu0 %v1491_v3 }
0x1453   :  { %1406 = vmatpush3.msra.mxu0 %v1107_v14 }
0x1454   :  { %1463 = vpow2.f32 %v1234_v61  ;;  %1407 = vmatprep.subr.mxu0 %v1491_v3 }
0x1455   :  { %1408 = vmatpush3.msra.mxu0 %v1106_v16 }
0x1456   :  { %1409 = vmatprep.subr.mxu0 %v1491_v3  ;;  %v1236_v3 = vld [vmem:[%s1789_s5] ss:$0 sm:$0xff] }
0x1457   :  { %1410 = vmatpush3.msra.mxu0 %v1105_v17 }
0x1461   :  { %v1464_v62 = vpop.eup %1463 }
0x1462   :  { %v1063_v63 = vadd.f32 1.0, %v1464_v62 }
0x1464   :  { %1465 = vrcp.f32 %v1063_v63 }
0x1471   :  { %v1466_v0 = vpop.eup %1465 }
0x1472   :  { %v1066_v1 = vmul.f32 2.0, %v1466_v0  ;;  %v1068_v15 = vmul.f32 %v1466_v0, %v967_v51 }
0x1474   :  { %v1235_v5 = vadd.f32 -1.0, %v1066_v1 }
0x1476   :  { %1070 = vrot.lane.b32.xlu1 %v1235_v5, %s1494_s3 }
0x14e8   :  { %v1071_v6 = vpop.permute.xlu1 %1070 }
0x14e9   :  { %v1073_v7 = vmul.f32 %v1466_v0, %v1071_v6 }
0x14eb   :  { %1075 = vrot.lane.b32.xlu0 %v1073_v7, %s1495_s17 }
0x155d   :  { %v1076_v12 = vpop.permute.xlu0 %1075 }
0x155e   :  { %v1078_v11 = vadd.f32 %v1076_v12, %v1068_v15 }
0x1560   :  { %1467 = vtanh.f32 %v1078_v11 }
0x156d   :  { %v1468_v18 = vpop.eup %1467 }
0x156e   :  { %1081 = vrot.lane.b32.xlu1 %v1468_v18, %s1494_s3 }
0x1572   :  { %1098 = vrot.lane.b32.xlu1 %v1078_v11, %s1496_s13 }
0x15e0   :  { %v1082_v19 = vpop.permute.xlu1 %1081 }
0x15e1   :  { %v1084_v21 = vmul.f32 %v1466_v0, %v1082_v19 }
0x15e3   :  { %1093 = vrot.lane.b32.xlu0 %v1084_v21, %s1495_s17 }
0x15e4   :  { %v1099_v22 = vpop.permute.xlu1 %1098 }
0x15e5   :  { %1101 = vst.msk [vmem:[#allocation4] sm:$0xff] %vm28_vm0, %v1099_v22 }
0x1655   :  { %v1094_v23 = vpop.permute.xlu0 %1093 }
0x1656   :  { %1096 = vst.msk [vmem:[#allocation3] sm:$0xff] %vm28_vm0, %v1094_v23  ;;  %1412 = vmatmul.mubr.msk.f32.vlgmr.msra.gmra.mxu0 %vm28_vm0, %v1094_v23 }
0x1716   :  { %v1184_v2 = vpop.f32.mrf.mxu0 }
0x1717   :  { %v1185_v24 = vadd.f32 %v1236_v3, %v1184_v2 }
0x1718   :  { %v1413_v25 = vpop.f32.mrf.mxu0 }
0x1719   :  { %1188 = vst [vmem:[#allocation5] sm:$0xff] %v1185_v24 }
0x171a   :  { %1480 = shalt.err (!%p1477_p4)
}
0x171b   :  { %1198 = dma.vmem_to_hbm [thread:$0]  %s1196_s16, 128, %s1790_s6, [#allocation6]  }
0x171c   :  { %1489 = dma.done.wait [#allocation6], 128  }
0x171d   :  { %1490 = vsyncadd [#allocation6], 4294967168 }
0x171e   :  { %1202 = vsyncpa [#allocation6], 1 }

</bundles_post_ra>
